<compile_context>
chip_gen: v6e
topology: v6e:2x2x1
jax: 0.10.0
libtpu: 0.0.40
codegen_flags: <defaults>
</compile_context>

<pallas_src>
import jax
import jax.numpy as jnp
from jax import lax
from jax.experimental import pallas as pl
from jax.experimental.pallas import tpu as pltpu

# ---------------- model hyper-parameters (consistent with the forward) --------
B, T = 2, 8            # batch, sequence length
C, H, W = 4, 16, 16    # per-frame image (NCHW in the PyTorch spec)
KH = KW = 3            # spatial conv kernel
COUT = 8               # spatial conv output channels
HID = 32               # feature dim fed to the temporal model
K1 = 3                 # temporal conv kernel size
NC = 5                 # number of output classes

N = B * T
ROWS = T * (H + 2)     # 144: H-padded rows of all T frames of one batch element
VR = ROWS - (KH - 1)   # 142: rows with a full 3-row vertical window
WC = W * C             # 64 : fused (width, in-channel) lane dim of the input
WO = W * COUT          # 128: fused (width, out-channel) lane dim of the conv


# ---------------- fused Pallas kernel (one batch element per grid step) -------
def fused_kernel(x_ref, wt_ref, btile_ref, wfc_ref, bfc_ref,
                 w1s_ref, b1_ref, w2_ref, b2_ref, out_ref):
    # x_ref    : (1, ROWS, WC)   H-padded NHWC frames, (W,C) fused on lanes
    # wt_ref   : (KH, WC, WO)    Toeplitz conv weights (horizontal taps folded in)
    # btile_ref: (1, WO)         conv bias tiled over W
    # wfc_ref  : (WO, HID)       FC weights tiled over W, scaled by 1/(H*W)
    # bfc_ref  : (1, HID)
    # w1s_ref  : (K1*HID, HID)   temporal conv(k=3) taps stacked on the K dim
    # b1_ref   : (1, HID)
    # w2_ref   : (NC, HID)       conv1d(k=1) weights
    # b2_ref   : (NC, 1)
    # out_ref  : (1, NC, T)
    xf = x_ref[0]                                                 # (144, 64)

    # ---- spatial conv: 3 vertical taps as Toeplitz matmuls, shifted rows ----
    conv = jnp.dot(xf[0:VR], wt_ref[0], preferred_element_type=jnp.float32)
    conv = conv + jnp.dot(xf[1:VR + 1], wt_ref[1],
                          preferred_element_type=jnp.float32)
    conv = conv + jnp.dot(xf[2:VR + 2], wt_ref[2],
                          preferred_element_type=jnp.float32)     # (142, 128)
    act = jnp.maximum(conv + btile_ref[...], 0.0)                 # ReLU

    # ---- global average pool (rows via MXU matmul, cols folded into wfc) ----
    tt = lax.broadcasted_iota(jnp.int32, (T, VR), 0)
    jj = lax.broadcasted_iota(jnp.int32, (T, VR), 1)
    lo = tt * (H + 2)
    pool = ((jj >= lo) & (jj < lo + H)).astype(jnp.float32)       # (T, 142)
    pooled = jnp.dot(pool, act, preferred_element_type=jnp.float32)   # (T, 128)
    feat = jnp.maximum(
        jnp.dot(pooled, wfc_ref[...], preferred_element_type=jnp.float32)
        + bfc_ref[...], 0.0)                                      # (T, HID)

    # ---- temporal model: k=3 conv folded into a single matmul ---------------
    z = jnp.zeros((1, HID), jnp.float32)
    fp = jnp.concatenate([z, feat, z], axis=0)                    # (T+2, HID)
    stacked = jnp.concatenate([fp[0:T], fp[1:T + 1], fp[2:T + 2]], axis=1)
    h = jnp.maximum(
        jnp.dot(stacked, w1s_ref[...], preferred_element_type=jnp.float32)
        + b1_ref[...], 0.0)                                       # (T, HID)
    # final 1x1 conv, produced directly in (NC, T) layout
    logits = lax.dot_general(w2_ref[...], h, (((1,), (1,)), ((), ())),
                             preferred_element_type=jnp.float32)  # (NC, T)
    out_ref[0] = logits + b2_ref[...]


def fused_call(xp, wt, btile, wfc_x, bfc_r, w1s, b1_r, w2_r, b2_r):
    return pl.pallas_call(
        fused_kernel,
        out_shape=jax.ShapeDtypeStruct((B, NC, T), jnp.float32),
        grid_spec=pltpu.PrefetchScalarGridSpec(
            num_scalar_prefetch=0,
            grid=(B,),
            in_specs=[
                pl.BlockSpec((1, ROWS, WC), lambda b: (b, 0, 0)),
                pl.BlockSpec((KH, WC, WO), lambda b: (0, 0, 0)),
                pl.BlockSpec((1, WO), lambda b: (0, 0)),
                pl.BlockSpec((WO, HID), lambda b: (0, 0)),
                pl.BlockSpec((1, HID), lambda b: (0, 0)),
                pl.BlockSpec((K1 * HID, HID), lambda b: (0, 0)),
                pl.BlockSpec((1, HID), lambda b: (0, 0)),
                pl.BlockSpec((NC, HID), lambda b: (0, 0)),
                pl.BlockSpec((NC, 1), lambda b: (0, 0)),
            ],
            out_specs=pl.BlockSpec((1, NC, T), lambda b: (b, 0, 0)),
        ),
        compiler_params=pltpu.CompilerParams(
            dimension_semantics=("parallel",)),
    )(xp, wt, btile, wfc_x, bfc_r, w1s, b1_r, w2_r, b2_r)


# ---------------- one-time parameter preprocessing -----------------------------
def prepare_params(params):
    wconv, bconv, wfc, bfc, w1, b1, w2, b2 = params
    # Toeplitz weights: wt[kh, col*C + ch, c*COUT + o] = wconv[kh, kw, ch, o]
    # with kw = col - c + 1 (zero outside 0..KW-1 => horizontal 'SAME' padding).
    col_in = jnp.arange(WC) // C
    ch = jnp.arange(WC) % C
    c_out = jnp.arange(WO) // COUT
    o_out = jnp.arange(WO) % COUT
    kw = col_in[:, None] - c_out[None, :] + 1                      # (WC, WO)
    valid = ((kw >= 0) & (kw < KW)).astype(wconv.dtype)
    kw_c = jnp.clip(kw, 0, KW - 1)
    wt = wconv[:, kw_c, ch[:, None], o_out[None, :]] * valid[None]  # (KH, WC, WO)

    btile = jnp.tile(bconv.reshape(1, COUT), (1, W))               # (1, WO)
    wfc_x = jnp.tile(wfc, (W, 1)) / float(H * W)                   # (WO, HID)
    bfc_r = bfc.reshape(1, HID)
    w1s = jnp.transpose(w1, (0, 2, 1)).reshape(K1 * HID, HID)      # (K1*HID, HID)
    b1_r = b1.reshape(1, HID)
    w2_r = w2                                                      # (NC, HID)
    b2_r = b2.reshape(NC, 1)
    return (wt, btile, wfc_x, bfc_r, w1s, b1_r, w2_r, b2_r)


# ---------------- end-to-end forward -------------------------------------------
def end_to_end_forward(x, prepped):
    """x: (B, T, C, H, W) float32 (PyTorch layout). Returns (B, NC, T)."""
    bsz, seq = x.shape[0], x.shape[1]
    # NCHW -> NHWC per frame, pad H by 1 on each side, fuse (W,C) onto lanes,
    # stack all frames' padded rows per batch element: (B, T*(H+2), W*C).
    xn = x.reshape(bsz * seq, C, H, W).transpose(0, 2, 3, 1)       # (N, H, W, C)
    xp = jnp.pad(xn, ((0, 0), (1, 1), (0, 0), (0, 0)))             # (N, H+2, W, C)
    xp = xp.reshape(bsz, seq * (H + 2), WC)
    return fused_call(xp, *prepped)


# ---------------- pure-JAX reference for correctness ---------------------------
def reference_forward(x, params):
    wconv, bconv, wfc, bfc, w1, b1, w2, b2 = params
    x_nhwc = x.reshape(-1, C, H, W).transpose(0, 2, 3, 1)
    conv = lax.conv_general_dilated(
        x_nhwc, wconv, window_strides=(1, 1), padding="SAME",
        dimension_numbers=("NHWC", "HWIO", "NHWC"))
    conv = jnp.maximum(conv + bconv.reshape(1, 1, 1, COUT), 0.0)
    pooled = conv.mean(axis=(1, 2))                                # (N, COUT)
    feat = jnp.maximum(pooled @ wfc + bfc, 0.0)                    # (N, HID)
    f = feat.reshape(B, T, HID).transpose(0, 2, 1)                 # (B, HID, T)
    fp = jnp.pad(f, ((0, 0), (0, 0), (1, 1)))
    h = jnp.zeros((B, HID, T), jnp.float32)
    for k in range(K1):
        h = h + jnp.einsum("of,bft->bot", w1[k], fp[:, :, k:k + T])
    h = jnp.maximum(h + b1.reshape(1, HID, 1), 0.0)
    return jnp.einsum("cf,bft->bct", w2, h) + b2.reshape(1, NC, 1)


# ---------------- deterministic parameter init & run ----------------------------
if __name__ == "__main__":
    key = jax.random.PRNGKey(0)
    ks = jax.random.split(key, 9)

    x = jax.random.normal(ks[0], (B, T, C, H, W), dtype=jnp.float32)

    wconv = 0.1 * jax.random.normal(ks[1], (KH, KW, C, COUT), dtype=jnp.float32)  # HWIO
    bconv = 0.1 * jax.random.normal(ks[2], (1, COUT), dtype=jnp.float32)
    wfc   = 0.1 * jax.random.normal(ks[3], (COUT, HID), dtype=jnp.float32)
    bfc   = 0.1 * jax.random.normal(ks[4], (1, HID), dtype=jnp.float32)
    w1    = 0.1 * jax.random.normal(ks[5], (K1, HID, HID), dtype=jnp.float32)      # (k, out, in)
    b1    = 0.1 * jax.random.normal(ks[6], (HID, 1), dtype=jnp.float32)
    w2    = 0.1 * jax.random.normal(ks[7], (NC, HID), dtype=jnp.float32)
    b2    = 0.1 * jax.random.normal(ks[8], (NC, 1), dtype=jnp.float32)

    params = (wconv, bconv, wfc, bfc, w1, b1, w2, b2)
    prepped = prepare_params(params)                 # one-time weight transform

    out = end_to_end_forward(x, prepped)
    out = jax.block_until_ready(out)

    ref = reference_forward(x, params)
    assert out.shape == (B, NC, T)
    assert jnp.allclose(out, ref, rtol=1e-4, atol=1e-4), "mismatch vs JAX reference"

    print("KERNEL_OK")
</pallas_src>

<mosaic_0001>
module attributes {stable_mosaic.version = 11 : i64} {
  func.func @fused_kernel(%arg0: i32, %arg1: memref<1x144x64xf32, #tpu.memory_space<vmem>>, %arg2: memref<3x64x128xf32, #tpu.memory_space<vmem>>, %arg3: memref<1x128xf32, #tpu.memory_space<vmem>>, %arg4: memref<128x32xf32, #tpu.memory_space<vmem>>, %arg5: memref<1x32xf32, #tpu.memory_space<vmem>>, %arg6: memref<96x32xf32, #tpu.memory_space<vmem>>, %arg7: memref<1x32xf32, #tpu.memory_space<vmem>>, %arg8: memref<5x32xf32, #tpu.memory_space<vmem>>, %arg9: memref<5x1xf32, #tpu.memory_space<vmem>>, %arg10: memref<1x5x8xf32, #tpu.memory_space<vmem>>) attributes {dimension_semantics = [#tpu.dimension_semantics<parallel>], iteration_bounds = array<i64: 2>, scalar_prefetch = 0 : i64, scratch_operands = 0 : i64, tpu.core_type = #tpu.core_type<tc>, window_params = [{transform_indices = @transform_0, window_bounds = array<i64: 1, 144, 64>}, {pipeline_mode = #tpu.pipeline_mode<synchronous>, transform_indices = @transform_1, window_bounds = array<i64: 3, 64, 128>}, {pipeline_mode = #tpu.pipeline_mode<synchronous>, transform_indices = @transform_2, window_bounds = array<i64: 1, 128>}, {pipeline_mode = #tpu.pipeline_mode<synchronous>, transform_indices = @transform_3, window_bounds = array<i64: 128, 32>}, {pipeline_mode = #tpu.pipeline_mode<synchronous>, transform_indices = @transform_4, window_bounds = array<i64: 1, 32>}, {pipeline_mode = #tpu.pipeline_mode<synchronous>, transform_indices = @transform_5, window_bounds = array<i64: 96, 32>}, {pipeline_mode = #tpu.pipeline_mode<synchronous>, transform_indices = @transform_6, window_bounds = array<i64: 1, 32>}, {pipeline_mode = #tpu.pipeline_mode<synchronous>, transform_indices = @transform_7, window_bounds = array<i64: 5, 32>}, {pipeline_mode = #tpu.pipeline_mode<synchronous>, transform_indices = @transform_8, window_bounds = array<i64: 5, 1>}, {transform_indices = @transform_9, window_bounds = array<i64: 1, 5, 8>}]} {
    %c0 = arith.constant 0 : index
    %c0_0 = arith.constant 0 : index
    %c0_1 = arith.constant 0 : index
    %0 = vector.load %arg1[%c0, %c0_0, %c0_1] : memref<1x144x64xf32, #tpu.memory_space<vmem>>, vector<1x144x64xf32>
    %1 = vector.shape_cast %0 : vector<1x144x64xf32> to vector<144x64xf32>
    %2 = vector.extract_strided_slice %1 {offsets = [0, 0], sizes = [142, 64], strides = [1, 1]} : vector<144x64xf32> to vector<142x64xf32>
    %c0_2 = arith.constant 0 : index
    %c0_3 = arith.constant 0 : index
    %c0_4 = arith.constant 0 : index
    %3 = vector.load %arg2[%c0_2, %c0_3, %c0_4] : memref<3x64x128xf32, #tpu.memory_space<vmem>>, vector<1x64x128xf32>
    %4 = vector.shape_cast %3 : vector<1x64x128xf32> to vector<64x128xf32>
    %cst = arith.constant dense<0.000000e+00> : vector<142x128xf32>
    %5 = tpu.matmul %2, %4, %cst {dimension_numbers = #tpu.dot_dimension_numbers<[1], [0], [0], [1], [0, 0, 1, 1], [], []>} : vector<142x64xf32>, vector<64x128xf32>, vector<142x128xf32> -> vector<142x128xf32>
    %6 = vector.extract_strided_slice %1 {offsets = [1, 0], sizes = [142, 64], strides = [1, 1]} : vector<144x64xf32> to vector<142x64xf32>
    %c1 = arith.constant 1 : index
    %c0_5 = arith.constant 0 : index
    %c0_6 = arith.constant 0 : index
    %7 = vector.load %arg2[%c1, %c0_5, %c0_6] : memref<3x64x128xf32, #tpu.memory_space<vmem>>, vector<1x64x128xf32>
    %8 = vector.shape_cast %7 : vector<1x64x128xf32> to vector<64x128xf32>
    %cst_7 = arith.constant dense<0.000000e+00> : vector<142x128xf32>
    %9 = tpu.matmul %6, %8, %cst_7 {dimension_numbers = #tpu.dot_dimension_numbers<[1], [0], [0], [1], [0, 0, 1, 1], [], []>} : vector<142x64xf32>, vector<64x128xf32>, vector<142x128xf32> -> vector<142x128xf32>
    %10 = arith.addf %5, %9 : vector<142x128xf32>
    %11 = vector.extract_strided_slice %1 {offsets = [2, 0], sizes = [142, 64], strides = [1, 1]} : vector<144x64xf32> to vector<142x64xf32>
    %c2 = arith.constant 2 : index
    %c0_8 = arith.constant 0 : index
    %c0_9 = arith.constant 0 : index
    %12 = vector.load %arg2[%c2, %c0_8, %c0_9] : memref<3x64x128xf32, #tpu.memory_space<vmem>>, vector<1x64x128xf32>
    %13 = vector.shape_cast %12 : vector<1x64x128xf32> to vector<64x128xf32>
    %cst_10 = arith.constant dense<0.000000e+00> : vector<142x128xf32>
    %14 = tpu.matmul %11, %13, %cst_10 {dimension_numbers = #tpu.dot_dimension_numbers<[1], [0], [0], [1], [0, 0, 1, 1], [], []>} : vector<142x64xf32>, vector<64x128xf32>, vector<142x128xf32> -> vector<142x128xf32>
    %15 = arith.addf %10, %14 : vector<142x128xf32>
    %c0_11 = arith.constant 0 : index
    %c0_12 = arith.constant 0 : index
    %16 = vector.load %arg3[%c0_11, %c0_12] : memref<1x128xf32, #tpu.memory_space<vmem>>, vector<1x128xf32>
    %17 = vector.broadcast %16 : vector<1x128xf32> to vector<142x128xf32>
    %18 = arith.addf %15, %17 : vector<142x128xf32>
    %cst_13 = arith.constant 0.000000e+00 : f32
    %19 = vector.broadcast %cst_13 : f32 to vector<142x128xf32>
    %20 = arith.maximumf %18, %19 : vector<142x128xf32>
    %21 = tpu.iota {dimensions = array<i32: 0>} : vector<8x142xi32>
    %22 = tpu.iota {dimensions = array<i32: 1>} : vector<8x142xi32>
    %c18_i32 = arith.constant 18 : i32
    %23 = vector.broadcast %c18_i32 : i32 to vector<8x142xi32>
    %24 = arith.muli %21, %23 : vector<8x142xi32>
    %25 = arith.cmpi sge, %22, %24 : vector<8x142xi32>
    %c16_i32 = arith.constant 16 : i32
    %26 = vector.broadcast %c16_i32 : i32 to vector<8x142xi32>
    %27 = arith.addi %24, %26 : vector<8x142xi32>
    %28 = arith.cmpi slt, %22, %27 : vector<8x142xi32>
    %29 = arith.andi %25, %28 : vector<8x142xi1>
    %30 = arith.extui %29 : vector<8x142xi1> to vector<8x142xi32>
    %31 = arith.sitofp %30 : vector<8x142xi32> to vector<8x142xf32>
    %cst_14 = arith.constant dense<0.000000e+00> : vector<8x128xf32>
    %32 = tpu.matmul %31, %20, %cst_14 {dimension_numbers = #tpu.dot_dimension_numbers<[1], [0], [0], [1], [0, 0, 1, 1], [], []>} : vector<8x142xf32>, vector<142x128xf32>, vector<8x128xf32> -> vector<8x128xf32>
    %c0_15 = arith.constant 0 : index
    %c0_16 = arith.constant 0 : index
    %33 = vector.load %arg4[%c0_15, %c0_16] : memref<128x32xf32, #tpu.memory_space<vmem>>, vector<128x32xf32>
    %cst_17 = arith.constant dense<0.000000e+00> : vector<8x32xf32>
    %34 = tpu.matmul %32, %33, %cst_17 {dimension_numbers = #tpu.dot_dimension_numbers<[1], [0], [0], [1], [0, 0, 1, 1], [], []>} : vector<8x128xf32>, vector<128x32xf32>, vector<8x32xf32> -> vector<8x32xf32>
    %c0_18 = arith.constant 0 : index
    %c0_19 = arith.constant 0 : index
    %35 = vector.load %arg5[%c0_18, %c0_19] : memref<1x32xf32, #tpu.memory_space<vmem>>, vector<1x32xf32>
    %36 = vector.broadcast %35 : vector<1x32xf32> to vector<8x32xf32>
    %37 = arith.addf %34, %36 : vector<8x32xf32>
    %cst_20 = arith.constant 0.000000e+00 : f32
    %38 = vector.broadcast %cst_20 : f32 to vector<8x32xf32>
    %39 = arith.maximumf %37, %38 : vector<8x32xf32>
    %cst_21 = arith.constant 0.000000e+00 : f32
    %40 = vector.broadcast %cst_21 : f32 to vector<1x32xf32>
    %41 = tpu.concatenate %40, %39, %40 in 0 : vector<1x32xf32>, vector<8x32xf32>, vector<1x32xf32> -> vector<10x32xf32>
    %42 = vector.extract_strided_slice %41 {offsets = [0, 0], sizes = [8, 32], strides = [1, 1]} : vector<10x32xf32> to vector<8x32xf32>
    %43 = vector.extract_strided_slice %41 {offsets = [1, 0], sizes = [8, 32], strides = [1, 1]} : vector<10x32xf32> to vector<8x32xf32>
    %44 = vector.extract_strided_slice %41 {offsets = [2, 0], sizes = [8, 32], strides = [1, 1]} : vector<10x32xf32> to vector<8x32xf32>
    %45 = tpu.concatenate %42, %43, %44 in 1 : vector<8x32xf32>, vector<8x32xf32>, vector<8x32xf32> -> vector<8x96xf32>
    %c0_22 = arith.constant 0 : index
    %c0_23 = arith.constant 0 : index
    %46 = vector.load %arg6[%c0_22, %c0_23] : memref<96x32xf32, #tpu.memory_space<vmem>>, vector<96x32xf32>
    %cst_24 = arith.constant dense<0.000000e+00> : vector<8x32xf32>
    %47 = tpu.matmul %45, %46, %cst_24 {dimension_numbers = #tpu.dot_dimension_numbers<[1], [0], [0], [1], [0, 0, 1, 1], [], []>} : vector<8x96xf32>, vector<96x32xf32>, vector<8x32xf32> -> vector<8x32xf32>
    %c0_25 = arith.constant 0 : index
    %c0_26 = arith.constant 0 : index
    %48 = vector.load %arg7[%c0_25, %c0_26] : memref<1x32xf32, #tpu.memory_space<vmem>>, vector<1x32xf32>
    %49 = vector.broadcast %48 : vector<1x32xf32> to vector<8x32xf32>
    %50 = arith.addf %47, %49 : vector<8x32xf32>
    %cst_27 = arith.constant 0.000000e+00 : f32
    %51 = vector.broadcast %cst_27 : f32 to vector<8x32xf32>
    %52 = arith.maximumf %50, %51 : vector<8x32xf32>
    %c0_28 = arith.constant 0 : index
    %c0_29 = arith.constant 0 : index
    %53 = vector.load %arg8[%c0_28, %c0_29] : memref<5x32xf32, #tpu.memory_space<vmem>>, vector<5x32xf32>
    %cst_30 = arith.constant dense<0.000000e+00> : vector<5x8xf32>
    %54 = tpu.matmul %53, %52, %cst_30 {dimension_numbers = #tpu.dot_dimension_numbers<[1], [1], [0], [0], [0, 0, 1, 0], [], []>} : vector<5x32xf32>, vector<8x32xf32>, vector<5x8xf32> -> vector<5x8xf32>
    %c0_31 = arith.constant 0 : index
    %c0_32 = arith.constant 0 : index
    %55 = vector.load %arg9[%c0_31, %c0_32] : memref<5x1xf32, #tpu.memory_space<vmem>>, vector<5x1xf32>
    %56 = vector.broadcast %55 : vector<5x1xf32> to vector<5x8xf32>
    %57 = arith.addf %54, %56 : vector<5x8xf32>
    %c0_33 = arith.constant 0 : index
    %c0_34 = arith.constant 0 : index
    %c0_35 = arith.constant 0 : index
    %58 = vector.load %arg10[%c0_33, %c0_34, %c0_35] : memref<1x5x8xf32, #tpu.memory_space<vmem>>, vector<1x5x8xf32>
    %59 = vector.shape_cast %58 : vector<1x5x8xf32> to vector<5x8xf32>
    %60 = vector.shape_cast %57 : vector<5x8xf32> to vector<1x5x8xf32>
    tpu.vector_store %arg10[%c0_33, %c0_34, %c0_35], %60 {strides = array<i32>} : memref<1x5x8xf32, #tpu.memory_space<vmem>>, vector<1x5x8xf32>,
    return
  }
  func.func @transform_0(%arg0: i32) -> (i32, i32, i32) {
    %c0_i32 = arith.constant 0 : i32
    %c0_i32_0 = arith.constant 0 : i32
    %c0_i32_1 = arith.constant 0 : i32
    return %arg0, %c0_i32, %c0_i32_0 : i32, i32, i32
  }
  func.func @transform_1(%arg0: i32) -> (i32, i32, i32) {
    %c0_i32 = arith.constant 0 : i32
    %c0_i32_0 = arith.constant 0 : i32
    %c0_i32_1 = arith.constant 0 : i32
    %c0_i32_2 = arith.constant 0 : i32
    return %c0_i32, %c0_i32_0, %c0_i32_1 : i32, i32, i32
  }
  func.func @transform_2(%arg0: i32) -> (i32, i32) {
    %c0_i32 = arith.constant 0 : i32
    %c0_i32_0 = arith.constant 0 : i32
    %c0_i32_1 = arith.constant 0 : i32
    return %c0_i32, %c0_i32_0 : i32, i32
  }
  func.func @transform_3(%arg0: i32) -> (i32, i32) {
    %c0_i32 = arith.constant 0 : i32
    %c0_i32_0 = arith.constant 0 : i32
    %c0_i32_1 = arith.constant 0 : i32
    return %c0_i32, %c0_i32_0 : i32, i32
  }
  func.func @transform_4(%arg0: i32) -> (i32, i32) {
    %c0_i32 = arith.constant 0 : i32
    %c0_i32_0 = arith.constant 0 : i32
    %c0_i32_1 = arith.constant 0 : i32
    return %c0_i32, %c0_i32_0 : i32, i32
  }
  func.func @transform_5(%arg0: i32) -> (i32, i32) {
    %c0_i32 = arith.constant 0 : i32
    %c0_i32_0 = arith.constant 0 : i32
    %c0_i32_1 = arith.constant 0 : i32
    return %c0_i32, %c0_i32_0 : i32, i32
  }
  func.func @transform_6(%arg0: i32) -> (i32, i32) {
    %c0_i32 = arith.constant 0 : i32
    %c0_i32_0 = arith.constant 0 : i32
    %c0_i32_1 = arith.constant 0 : i32
    return %c0_i32, %c0_i32_0 : i32, i32
  }
  func.func @transform_7(%arg0: i32) -> (i32, i32) {
    %c0_i32 = arith.constant 0 : i32
    %c0_i32_0 = arith.constant 0 : i32
    %c0_i32_1 = arith.constant 0 : i32
    return %c0_i32, %c0_i32_0 : i32, i32
  }
  func.func @transform_8(%arg0: i32) -> (i32, i32) {
    %c0_i32 = arith.constant 0 : i32
    %c0_i32_0 = arith.constant 0 : i32
    %c0_i32_1 = arith.constant 0 : i32
    return %c0_i32, %c0_i32_0 : i32, i32
  }
  func.func @transform_9(%arg0: i32) -> (i32, i32, i32) {
    %c0_i32 = arith.constant 0 : i32
    %c0_i32_0 = arith.constant 0 : i32
    %c0_i32_1 = arith.constant 0 : i32
    return %arg0, %c0_i32, %c0_i32_0 : i32, i32, i32
  }
}

</mosaic_0001>

<bundles_post_ra>
// kernel: tpu_custom_call.1
= control target key start
LH: loop header
LB: loop body
LE: loop exit
PB: predicated region body
PF: predicated region fallthrough
CT: control target
= control target key end

     0   :  { %s2020_s30 = smov 0   ;;  %s2560_s0 = inlined_call_operand.vmem [shape: f32[2,144,64], index: 0, kind: input, shape index: {}]   ;;  %s2561_s1 = inlined_call_operand.vmem [shape: f32[3,64,128], index: 1, kind: input, shape index: {}]   ;;  %s2562_s2 = inlined_call_operand.vmem [shape: f32[1,128], index: 2, kind: input, shape index: {}]   ;;  %s2563_s3 = inlined_call_operand.vmem [shape: f32[128,32], index: 3, kind: input, shape index: {}]   ;;  %s2564_s4 = inlined_call_operand.vmem [shape: f32[1,32], index: 4, kind: input, shape index: {}]   ;;  %s2565_s5 = inlined_call_operand.vmem [shape: f32[96,32], index: 5, kind: input, shape index: {}]   ;;  %s2566_s6 = inlined_call_operand.vmem [shape: f32[1,32], index: 6, kind: input, shape index: {}]   ;;  %s2567_s7 = inlined_call_operand.vmem [shape: f32[5,32], index: 7, kind: input, shape index: {}]   ;;  %s2568_s8 = inlined_call_operand.vmem [shape: f32[5,1], index: 8, kind: input, shape index: {}]   ;;  %s2569_s9 = inlined_call_operand.vmem [shape: f32[2,5,8], index: 9, kind: output, shape index: {}]  }
   0x1 LB: > { %s1543_s10 = sadd.s32 4294967295, %s1962_s30   ;;  %p1547_p0 = scmp.ge.s32.totalorder %s1962_s30, 1  ;;  %s1962_s30 = sphi %s2020_s30, %s19_s30  }
   0x2   : > { %p287_p1 = scmp.lt.s32.totalorder %s1962_s30, 3 }
   0x4   : > { %p288_p2 = pnand %p1547_p0, %p287_p1 }
   0x5   : > { %p322_p3 = scmp.lt.s32.totalorder (!%p288_p2), %s1543_s10, 1  ;;  %s1967_s28 = smov (!%p288_p2), 32  }
   0x6   : > { %291 = sbr.rel (%p288_p2) target bundleno = 1240 (0x4d8), region = 56  ;;  %s1968_s29 = smov (!%p288_p2), 64  }
   0xb   : > { %v1557_v0 = vld [vmem:[%s2561_s1 + $0x78] sm:$0xff]  ;;  %v1556_v2 = vld [vmem:[%s2561_s1 + $0x70] sm:$0xff]  ;;  %v1555_v4 = vld [vmem:[%s2561_s1 + $0x68] sm:$0xff]  ;;  %s2576_s10 = smov (!%p322_p3, %s1543_s10), 1  ;;  %vm384_vm0 = vcmask 1046528   ;;  %vm420_vm1 = vcmask 523264  }
   0xc   : > { %v356_v1 = vld [vmem:[%s2561_s1 + $0x38] sm:$0xff]  ;;  %1743 = vmatprep.subr.mxu0 %v1557_v0  ;;  %v355_v3 = vld [vmem:[%s2561_s1 + $0x30] sm:$0xff]  ;;  %v354_v5 = vld [vmem:[%s2561_s1 + $0x28] sm:$0xff]  ;;  %s1939_s27 = smul.u32 144, %s2576_s10  ;;  %vm812_vm2 = vcmask 1045504   ;;  %vm1117_vm6 = vcmask 113664  }
   0xd   : > { %1786 = vmatprep.subr.mxu1 %v356_v1  ;;  %1744 = vmatpush3.msra.mxu0 %v1557_v0  ;;  %v1554_v6 = vld [vmem:[%s2561_s1 + $0x60] sm:$0xff]  ;;  %v1553_v8 = vld [vmem:[%s2561_s1 + $0x58] sm:$0xff]  ;;  %v1552_v12 = vld [vmem:[%s2561_s1 + $0x50] sm:$0xff]  ;;  %vm1966_vm10 = vmmov 0   ;;  %vm1291_vm11 = vcmask 1040384   ;;  %vm1308_vm12 = vcmask 261120  }
   0xe   : > { %1787 = vmatpush3.msra.mxu1 %v356_v1  ;;  %1745 = vmatprep.subr.mxu0 %v1556_v2  ;;  %v353_v7 = vld [vmem:[%s2561_s1 + $0x20] sm:$0xff]  ;;  %v352_v9 = vld [vmem:[%s2561_s1 + $0x18] sm:$0xff]  ;;  %s2064_s15 = scalar_lea.vmem %s2560_s0, %s1939_s27  ;;  %v351_v13 = vld [vmem:[%s2561_s1 + $0x10] sm:$0xff]  ;;  %vm1330_vm13 = vcmask 785408   ;;  %s1549_s18 = sshll.u32 %s2576_s10, 3  ;;  %vm1488_vm14 = vcmask 61440  }
   0xf   : > { %1788 = vmatprep.subr.mxu1 %v355_v3  ;;  %1746 = vmatpush3.msra.mxu0 %v1556_v2  ;;  %v2067_v10 = vld [vmem:[%s2064_s15] sm:$0xff]  ;;  %v2070_v11 = vld [vmem:[%s2064_s15 + $0x8] sm:$0xff]  ;;  %v2079_v14 = vld [vmem:[%s2064_s15 + $0x10] sm:$0xff]  ;;  %s330_s21 = scalar_lea.vmem %s2569_s9, %s1549_s18 }
  0x10   : > { %1789 = vmatpush3.msra.mxu1 %v355_v3  ;;  %1747 = vmatprep.subr.mxu0 %v1555_v4  ;;  %v385_v15 = vrot.slane %v2067_v10, 1  ;;  %v386_v16 = vrot.slane %v2070_v11, 1  ;;  %v2084_v17 = vld [vmem:[%s2064_s15 + $0x18] sm:$0xff]  ;;  %v1551_v18 = vld [vmem:[%s2561_s1 + $0x48] sm:$0xff]  ;;  %v388_v20 = vrot.slane %v2079_v14, 1  ;;  %v1550_v21 = vld [vmem:[%s2561_s1 + $0x40] sm:$0xff] }
  0x11   : > { %1790 = vmatprep.subr.mxu1 %v354_v5  ;;  %1748 = vmatpush3.msra.mxu0 %v1555_v4  ;;  %v350_v19 = vld [vmem:[%s2561_s1 + $0x8] sm:$0xff]  ;;  %v349_v22 = vld [vmem:[%s2561_s1] sm:$0xff]  ;;  %v390_v23 = vrot.slane %v2084_v17, 1  ;;  %v1601_v29 = vld [vmem:[%s2561_s1 + $0xb8] sm:$0xff] }
  0x12   : > { %1791 = vmatpush3.msra.mxu1 %v354_v5  ;;  %1749 = vmatprep.subr.mxu0 %v1554_v6  ;;  %v2101_v24 = vld [vmem:[%s2064_s15 + $0x20] sm:$0xff]  ;;  %v387_v25 = vsel %vm384_vm0, %v385_v15, %v386_v16  ;;  %v2105_v26 = vld [vmem:[%s2064_s15 + $0x28] sm:$0xff]  ;;  %v389_v27 = vsel %vm384_vm0, %v386_v16, %v388_v20  ;;  %v2116_v32 = vld [vmem:[%s2064_s15 + $0x30] sm:$0xff]  ;;  %v813_v16 = vrot.slane %v2067_v10, 2 }
  0x13   : > { %1792 = vmatprep.subr.mxu1 %v353_v7  ;;  %1750 = vmatpush3.msra.mxu0 %v1554_v6  ;;  %v392_v28 = vrot.slane %v2101_v24, 1  ;;  %v391_v30 = vsel %vm384_vm0, %v388_v20, %v390_v23  ;;  %v394_v31 = vrot.slane %v2105_v26, 1  ;;  %v2121_v33 = vld [vmem:[%s2064_s15 + $0x38] sm:$0xff]  ;;  %v1600_v34 = vld [vmem:[%s2561_s1 + $0xb0] sm:$0xff]  ;;  %v396_v36 = vrot.slane %v2116_v32, 1  ;;  %v2137_v39 = vld [vmem:[%s2064_s15 + $0x40] sm:$0xff] }
  0x14   : > { %1793 = vmatpush3.msra.mxu1 %v353_v7  ;;  %1751 = vmatprep.subr.mxu0 %v1553_v8  ;;  %v398_v38 = vrot.slane %v2121_v33, 1  ;;  %v1599_v40 = vld [vmem:[%s2561_s1 + $0xa8] sm:$0xff]  ;;  %v400_v43 = vrot.slane %v2137_v39, 1  ;;  %v2156_v46 = vld [vmem:[%s2064_s15 + $0x50] sm:$0xff]  ;;  %v1598_v47 = vld [vmem:[%s2561_s1 + $0xa0] sm:$0xff] }
  0x15   : > { %1794 = vmatprep.subr.mxu1 %v352_v9  ;;  %1752 = vmatpush3.msra.mxu0 %v1553_v8  ;;  %v393_v35 = vsel %vm384_vm0, %v390_v23, %v392_v28  ;;  %v395_v37 = vsel %vm384_vm0, %v392_v28, %v394_v31  ;;  %v2143_v41 = vld [vmem:[%s2064_s15 + $0x48] sm:$0xff]  ;;  %v397_v42 = vsel %vm384_vm0, %v394_v31, %v396_v36  ;;  %v2162_v48 = vld [vmem:[%s2064_s15 + $0x58] sm:$0xff]  ;;  %v404_v50 = vrot.slane %v2156_v46, 1  ;;  %v2175_v53 = vld [vmem:[%s2064_s15 + $0x60] sm:$0xff] }
  0x16   : > { %1795 = vmatpush3.msra.mxu1 %v352_v9  ;;  %1753 = vmatprep.subr.mxu0 %v1552_v12  ;;  %v399_v44 = vsel %vm384_vm0, %v396_v36, %v398_v38  ;;  %v402_v45 = vrot.slane %v2143_v41, 1  ;;  %v401_v49 = vsel %vm384_vm0, %v398_v38, %v400_v43  ;;  %v406_v52 = vrot.slane %v2162_v48, 1  ;;  %v1597_v54 = vld [vmem:[%s2561_s1 + $0x98] sm:$0xff]  ;;  %v2181_v55 = vld [vmem:[%s2064_s15 + $0x68] sm:$0xff]  ;;  %v2194_v60 = vld [vmem:[%s2064_s15 + $0x70] sm:$0xff] }
  0x17   : > { %1796 = vmatprep.subr.mxu1 %v351_v13  ;;  %1754 = vmatpush3.msra.mxu0 %v1552_v12  ;;  %v408_v57 = vrot.slane %v2175_v53, 1  ;;  %v410_v59 = vrot.slane %v2181_v55, 1  ;;  %v1596_v61 = vld [vmem:[%s2561_s1 + $0x90] sm:$0xff]  ;;  %v2200_v62 = vld [vmem:[%s2064_s15 + $0x78] sm:$0xff]  ;;  %v412_v0 = vrot.slane %v2194_v60, 1  ;;  %v2213_v3 = vld [vmem:[%s2064_s15 + $0x80] sm:$0xff] }
  0x18   : > { %1797 = vmatpush3.msra.mxu1 %v351_v13  ;;  %1755 = vmatprep.subr.mxu0 %v1551_v18  ;;  %v403_v51 = vsel %vm384_vm0, %v400_v43, %v402_v45  ;;  %v405_v56 = vsel %vm384_vm0, %v402_v45, %v404_v50  ;;  %v407_v58 = vsel %vm384_vm0, %v404_v50, %v406_v52  ;;  %v414_v2 = vrot.slane %v2200_v62, 1  ;;  %v1595_v4 = vld [vmem:[%s2561_s1 + $0x88] sm:$0xff]  ;;  %v1594_v12 = vld [vmem:[%s2561_s1 + $0x80] sm:$0xff] }
  0x19   : > { %1798 = vmatprep.subr.mxu1 %v350_v19  ;;  %1756 = vmatpush3.msra.mxu0 %v1551_v18  ;;  %v409_v63 = vsel %vm384_vm0, %v406_v52, %v408_v57  ;;  %v411_v1 = vsel %vm384_vm0, %v408_v57, %v410_v59  ;;  %v2219_v5 = vld [vmem:[%s2064_s15 + $0x88] sm:$0xff]  ;;  %v413_v6 = vsel %vm384_vm0, %v410_v59, %v412_v0  ;;  %v416_v7 = vrot.slane %v2213_v3, 1 }
  0x1a   : > { %1799 = vmatpush3.msra.mxu1 %v350_v19  ;;  %1757 = vmatprep.subr.mxu0 %v1550_v21  ;;  %v415_v8 = vsel %vm384_vm0, %v412_v0, %v414_v2  ;;  %v418_v9 = vrot.slane %v2219_v5, 1  ;;  %v814_v18 = vrot.slane %v2070_v11, 2  ;;  %v816_v19 = vrot.slane %v2079_v14, 2 }
  0x1b   : > { %1800 = vmatprep.subr.mxu1 %v349_v22  ;;  %1758 = vmatpush3.msra.mxu0 %v1550_v21  ;;  %v417_v13 = vsel %vm384_vm0, %v414_v2, %v416_v7  ;;  %v824_v23 = vrot.slane %v2116_v32, 2  ;;  %v832_v31 = vrot.slane %v2156_v46, 2  ;;  %v844_v43 = vrot.slane %v2213_v3, 2 }
  0x1c   : > { %1759 = vmatprep.mubr.msk.f32.mxu0 %vm420_vm1, %v387_v25  ;;  %1801 = vmatpush3.msra.mxu1 %v349_v22  ;;  %v419_v15 = vsel %vm384_vm0, %v416_v7, %v418_v9  ;;  %v815_v20 = vsel %vm812_vm2, %v813_v16, %v814_v18  ;;  %v822_v22 = vrot.slane %v2105_v26, 2  ;;  %v846_v45 = vrot.slane %v2219_v5, 2 }
  0x1d   : > { %1802 = vmatprep.mubr.msk.f32.mxu1 %vm420_vm1, %v2067_v10  ;;  %1760 = vmatmul.mubr.msk.f32.vlgmr.msra.gmra.mxu0 %vm420_vm1, %v389_v27  ;;  %v818_v10 = vrot.slane %v2084_v17, 2  ;;  %v826_v27 = vrot.slane %v2121_v33, 2 }
  0x1e   : > { %1803 = vmatmul.mubr.msk.f32.vlgmr.msra.gmra.mxu1 %vm420_vm1, %v2070_v11  ;;  %1829 = vmatprep.subr.mxu0 %v1601_v29  ;;  %v817_v11 = vsel %vm812_vm2, %v814_v18, %v816_v19 }
  0x1f   : > { %1762 = vmatprep.mubr.msk.f32.mxu0 %vm420_vm1, %v391_v30  ;;  %1830 = vmatpush3.msra.mxu0 %v1601_v29  ;;  %v819_v21 = vsel %vm812_vm2, %v816_v19, %v818_v10  ;;  %v827_v28 = vsel %vm812_vm2, %v824_v23, %v826_v27  ;;  %v830_v29 = vrot.slane %v2143_v41, 2 }
  0x20   : > { %1805 = vmatprep.mubr.msk.f32.mxu1 %vm420_vm1, %v2079_v14  ;;  %1831 = vmatprep.subr.mxu0 %v1600_v34  ;;  %v820_v14 = vrot.slane %v2101_v24, 2 }
  0x21   : > { %1763 = vmatmul.mubr.msk.f32.gmra.mxu0 %vm420_vm1, %v393_v35  ;;  %v836_v35 = vrot.slane %v2175_v53, 2 }
  0x22   : > { %1806 = vmatmul.mubr.msk.f32.gmra.mxu1 %vm420_vm1, %v2084_v17  ;;  %1832 = vmatpush3.msra.mxu0 %v1600_v34  ;;  %v821_v17 = vsel %vm812_vm2, %v818_v10, %v820_v14  ;;  %v823_v25 = vsel %vm812_vm2, %v820_v14, %v822_v22  ;;  %v833_v34 = vsel %vm812_vm2, %v830_v29, %v832_v31 }
  0x23   : > { %1765 = vmatprep.mubr.msk.f32.mxu0 %vm420_vm1, %v395_v37  ;;  %1808 = vmatprep.mubr.msk.f32.mxu1 %vm420_vm1, %v2101_v24  ;;  %v825_v24 = vsel %vm812_vm2, %v822_v22, %v824_v23  ;;  %v838_v37 = vrot.slane %v2181_v55, 2 }
  0x24   : > { %1833 = vmatprep.subr.mxu0 %v1599_v40 }
  0x25   : > { %1834 = vmatpush3.msra.mxu0 %v1599_v40  ;;  %v839_v40 = vsel %vm812_vm2, %v836_v35, %v838_v37 }
  0x26   : > { %1766 = vmatmul.mubr.msk.f32.gmra.mxu0 %vm420_vm1, %v397_v42  ;;  %1809 = vmatmul.mubr.msk.f32.gmra.mxu1 %vm420_vm1, %v2105_v26  ;;  %v828_v26 = vrot.slane %v2137_v39, 2 }
  0x27   : > { %1768 = vmatprep.mubr.msk.f32.mxu0 %vm420_vm1, %v399_v44  ;;  %1811 = vmatprep.mubr.msk.f32.mxu1 %vm420_vm1, %v2116_v32 }
  0x28   : > { %1835 = vmatprep.subr.mxu0 %v1598_v47  ;;  %v829_v30 = vsel %vm812_vm2, %v826_v27, %v828_v26  ;;  %v831_v32 = vsel %vm812_vm2, %v828_v26, %v830_v29 }
  0x29   : > { %1836 = vmatpush3.msra.mxu0 %v1598_v47  ;;  %v847_v47 = vsel %vm812_vm2, %v844_v43, %v846_v45 }
  0x2a   : > { %1769 = vmatmul.mubr.msk.f32.gmra.mxu0 %vm420_vm1, %v401_v49  ;;  %1812 = vmatmul.mubr.msk.f32.gmra.mxu1 %vm420_vm1, %v2121_v33  ;;  %v834_v33 = vrot.slane %v2162_v48, 2  ;;  %v1100_v49 = vlaneseq }
  0x2b   : > { %1771 = vmatprep.mubr.msk.f32.mxu0 %vm420_vm1, %v403_v51  ;;  %1814 = vmatprep.mubr.msk.f32.mxu1 %vm420_vm1, %v2137_v39  ;;  %v840_v39 = vrot.slane %v2194_v60, 2 }
  0x2c   : > { %1837 = vmatprep.subr.mxu0 %v1597_v54  ;;  %v835_v36 = vsel %vm812_vm2, %v832_v31, %v834_v33  ;;  %v837_v38 = vsel %vm812_vm2, %v834_v33, %v836_v35  ;;  %v1101_v50 = vshrl.u32 %v1100_v49, 7  ;;  %v1103_v51 = vand.u32 127, %v1100_v49  ;;  %v2358_v49 = vld [vmem:[%s2562_s2] ss:$0 sm:$0xff] }
  0x2d   : > { %1838 = vmatpush3.msra.mxu0 %v1597_v54  ;;  %v841_v42 = vsel %vm812_vm2, %v838_v37, %v840_v39 }
  0x2e   : > { %1772 = vmatmul.mubr.msk.f32.gmra.mxu0 %vm420_vm1, %v405_v56  ;;  %1815 = vmatmul.mubr.msk.f32.gmra.mxu1 %vm420_vm1, %v2143_v41  ;;  %v842_v41 = vrot.slane %v2200_v62, 2  ;;  %v1105_v52 = vmul.u32 18, %v1101_v50  ;;  %v1206_v56 = vld [vmem:[%s2563_s3 + $0x60] sm:$0xff] }
  0x2f   : > { %1774 = vmatprep.mubr.msk.f32.mxu0 %vm420_vm1, %v407_v58  ;;  %1817 = vmatprep.mubr.msk.f32.mxu1 %vm420_vm1, %v2156_v46 }
  0x30   : > { %1839 = vmatprep.subr.mxu0 %v1596_v61  ;;  %v843_v44 = vsel %vm812_vm2, %v840_v39, %v842_v41  ;;  %v845_v46 = vsel %vm812_vm2, %v842_v41, %v844_v43  ;;  %v1108_v54 = vadd.s32 16, %v1105_v52  ;;  %vm1106_vm7 = vcmp.ge.s32.totalorder %v1103_v51, %v1105_v52 }
  0x31   : > { %1840 = vmatpush3.msra.mxu0 %v1596_v61 }
  0x32   : > { %1775 = vmatmul.mubr.msk.f32.gmra.mxu0 %vm420_vm1, %v409_v63  ;;  %1818 = vmatmul.mubr.msk.f32.gmra.mxu1 %vm420_vm1, %v2162_v48  ;;  %v2570_v48 = vmov 0.0   ;;  %vm1109_vm8 = vcmp.lt.s32.totalorder %v1103_v51, %v1108_v54 }
  0x33   : > { %1777 = vmatprep.mubr.msk.f32.mxu0 %vm420_vm1, %v411_v1  ;;  %1820 = vmatprep.mubr.msk.f32.mxu1 %vm420_vm1, %v2175_v53  ;;  %v1104_v53 = vadd.s32 128, %v1103_v51  ;;  %vm2307_vm9 = vmand %vm1106_vm7, %vm1109_vm8 }
  0x34   : > { %1841 = vmatprep.subr.mxu0 %v1595_v4  ;;  %1124 = vmatprep.subr.mxu1 %v2570_v48 }
  0x35   : > { %1842 = vmatpush3.msra.mxu0 %v1595_v4  ;;  %vm1107_vm3 = vcmp.ge.s32.totalorder %v1104_v53, %v1105_v52  ;;  %vm1110_vm4 = vcmp.lt.s32.totalorder %v1104_v53, %v1108_v54 }
  0x36   : > { %1778 = vmatmul.mubr.msk.f32.gmra.mxu0 %vm420_vm1, %v413_v6  ;;  %1821 = vmatmul.mubr.msk.f32.gmra.mxu1 %vm420_vm1, %v2181_v55  ;;  %vm1112_vm5 = vmand %vm1107_vm3, %vm1110_vm4 }
  0x37   : > { %1780 = vmatprep.mubr.msk.f32.mxu0 %vm420_vm1, %v415_v8  ;;  %1823 = vmatprep.mubr.msk.f32.mxu1 %vm420_vm1, %v2194_v60  ;;  %v1622_v55 = vsel %vm1112_vm5, 1.0, %v2570_v48 }
  0x38   : > { %1843 = vmatprep.subr.mxu0 %v1594_v12 }
  0x39   : > { %1844 = vmatpush3.msra.mxu0 %v1594_v12 }
  0x3a   : > { %1781 = vmatmul.mubr.msk.f32.gmra.mxu0 %vm420_vm1, %v417_v13  ;;  %1824 = vmatmul.mubr.msk.f32.gmra.mxu1 %vm420_vm1, %v2200_v62 }
  0x3b   : > { %1783 = vmatprep.mubr.msk.f32.mxu0 %vm420_vm1, %v419_v15  ;;  %1826 = vmatprep.mubr.msk.f32.mxu1 %vm420_vm1, %v2213_v3 }
  0x3c   : > { %1907 = vmatprep.subr.mxu0 %v2570_v48 }
  0x3e   : > { %1784 = vmatmul.mubr.msk.f32.gmra.mxu0 %vm420_vm1, %v418_v9  ;;  %1827 = vmatmul.mubr.msk.f32.gmra.mxu1 %vm420_vm1, %v2219_v5 }
  0x3f   : > { %1845 = vmatprep.mubr.msk.f32.mxu0 %vm420_vm1, %v815_v20  ;;  %1624 = vmatprep.mubr.msk.f32.mxu1 %vm1117_vm6, %v1622_v55 }
  0x42   : > { %1846 = vmatmul.mubr.msk.f32.vlgmr.msra.gmra.mxu0 %vm420_vm1, %v817_v11 }
  0x43   : > { %1848 = vmatprep.mubr.msk.f32.mxu0 %vm420_vm1, %v819_v21 }
  0x46   : > { %1849 = vmatmul.mubr.msk.f32.gmra.mxu0 %vm420_vm1, %v821_v17 }
  0x47   : > { %1851 = vmatprep.mubr.msk.f32.mxu0 %vm420_vm1, %v823_v25 }
  0x4a   : > { %1852 = vmatmul.mubr.msk.f32.gmra.mxu0 %vm420_vm1, %v825_v24 }
  0x4b   : > { %1854 = vmatprep.mubr.msk.f32.mxu0 %vm420_vm1, %v827_v28 }
  0x4e   : > { %1855 = vmatmul.mubr.msk.f32.gmra.mxu0 %vm420_vm1, %v829_v30 }
  0x4f   : > { %1857 = vmatprep.mubr.msk.f32.mxu0 %vm420_vm1, %v831_v32 }
  0x52   : > { %1858 = vmatmul.mubr.msk.f32.gmra.mxu0 %vm420_vm1, %v833_v34 }
  0x53   : > { %1860 = vmatprep.mubr.msk.f32.mxu0 %vm420_vm1, %v835_v36 }
  0x56   : > { %1861 = vmatmul.mubr.msk.f32.gmra.mxu0 %vm420_vm1, %v837_v38 }
  0x57   : > { %1863 = vmatprep.mubr.msk.f32.mxu0 %vm420_vm1, %v839_v40 }
  0x5a   : > { %1864 = vmatmul.mubr.msk.f32.gmra.mxu0 %vm420_vm1, %v841_v42 }
  0x5b   : > { %1866 = vmatprep.mubr.msk.f32.mxu0 %vm420_vm1, %v843_v44 }
  0x5e   : > { %1867 = vmatmul.mubr.msk.f32.gmra.mxu0 %vm420_vm1, %v845_v46 }
  0x5f   : > { %1869 = vmatprep.mubr.msk.f32.mxu0 %vm420_vm1, %v847_v47 }
  0x62   : > { %1870 = vmatmul.mubr.msk.f32.gmra.mxu0 %vm420_vm1, %v846_v45 }
  0xdd   : > { %v2311_v57 = vpop.f32.mrf.mxu0 }
  0xde   : > { %v2313_v58 = vpop.f32.mrf.mxu1 }
  0xdf   : > { %v2315_v59 = vpop.f32.mrf.mxu0 }
  0xe0   : > { %v2319_v61 = vpop.f32.mrf.mxu1 }
  0xe1   : > { %v2317_v60 = vpop.f32.mrf.mxu0 }
  0xe2   : > { %v2325_v0 = vpop.f32.mrf.mxu1 }
  0xe3   : > { %v2321_v62 = vpop.f32.mrf.mxu0 }
  0xe4   : > { %v2331_v3 = vpop.f32.mrf.mxu1 }
  0xe6   : > { %v2323_v63 = vpop.f32.mrf.mxu0  ;;  %v2335_v6 = vpop.f32.mrf.mxu1 }
  0xe8   : > { %v2327_v1 = vpop.f32.mrf.mxu0  ;;  %v2337_v9 = vpop.f32.mrf.mxu1 }
  0xea   : > { %v2329_v2 = vpop.f32.mrf.mxu0  ;;  %v1813_v15 = vpop.f32.mrf.mxu1 }
  0xec   : > { %v2333_v4 = vpop.f32.mrf.mxu0  ;;  %v744_v19 = vpop.f32.mrf.mxu1 }
  0xee   : > { %v1773_v5 = vpop.f32.mrf.mxu0  ;;  %v1816_v11 = vpop.f32.mrf.mxu1 }
  0xf0   : > { %v563_v7 = vpop.f32.mrf.mxu0  ;;  %v754_v22 = vpop.f32.mrf.mxu1 }
  0xf2   : > { %v1776_v8 = vpop.f32.mrf.mxu0  ;;  %v1819_v25 = vpop.f32.mrf.mxu1 }
  0xf3   : > { %v770_v51 = vadd.f32 %v1819_v25, %v1776_v8  ;;  %v755_v8 = vadd.f32 %v754_v22, %v563_v7 }
  0xf4   : > { %v573_v12 = vpop.f32.mrf.mxu0  ;;  %v764_v26 = vpop.f32.mrf.mxu1 }
  0xf5   : > { %v765_v55 = vadd.f32 %v764_v26, %v573_v12  ;;  %v750_v12 = vadd.f32 %v1813_v15, %v2329_v2 }
  0xf6   : > { %v1779_v13 = vpop.f32.mrf.mxu0  ;;  %v1822_v30 = vpop.f32.mrf.mxu1 }
  0xf7   : > { %v780_v41 = vadd.f32 %v1822_v30, %v1779_v13 }
  0xf8   : > { %v583_v16 = vpop.f32.mrf.mxu0  ;;  %v774_v33 = vpop.f32.mrf.mxu1 }
  0xf9   : > { %v775_v44 = vadd.f32 %v774_v33, %v583_v16 }
  0xfa   : > { %v1782_v18 = vpop.f32.mrf.mxu0  ;;  %v1825_v36 = vpop.f32.mrf.mxu1 }
  0xfb   : > { %v790_v42 = vadd.f32 %v1825_v36, %v1782_v18 }
  0xfc   : > { %v593_v20 = vpop.f32.mrf.mxu0  ;;  %v784_v39 = vpop.f32.mrf.mxu1 }
  0xfd   : > { %v785_v45 = vadd.f32 %v784_v39, %v593_v20  ;;  %v760_v20 = vadd.f32 %v1816_v11, %v1773_v5 }
  0xfe   : > { %v2339_v10 = vpop.f32.mrf.mxu0 }
 0x100   : > { %v2341_v14 = vpop.f32.mrf.mxu0 }
 0x102   : > { %v2343_v21 = vpop.f32.mrf.mxu0 }
 0x104   : > { %v2345_v17 = vpop.f32.mrf.mxu0 }
 0x106   : > { %v2347_v23 = vpop.f32.mrf.mxu0 }
 0x108   : > { %v2349_v27 = vpop.f32.mrf.mxu0 }
 0x10a   : > { %v2351_v24 = vpop.f32.mrf.mxu0 }
 0x10c   : > { %v2353_v28 = vpop.f32.mrf.mxu0 }
 0x10e   : > { %v1856_v29 = vpop.f32.mrf.mxu0 }
 0x110   : > { %v980_v31 = vpop.f32.mrf.mxu0 }
 0x112   : > { %v1859_v32 = vpop.f32.mrf.mxu0 }
 0x113   : > { %v1048_v25 = vadd.f32 %v1859_v32, %v760_v20  ;;  %v1209_v20 = vld [vmem:[%s2563_s3 + $0x78] sm:$0xff] }
 0x114   : > { %v990_v34 = vpop.f32.mrf.mxu0 }
 0x115   : > { %v1047_v26 = vadd.f32 %v990_v34, %v755_v8  ;;  %v1073_v7 = vadd.f32 %v2358_v49, %v1048_v25  ;;  %v1204_v8 = vld [vmem:[%s2563_s3 + $0x50] sm:$0xff]  ;;  %v1203_v25 = vld [vmem:[%s2563_s3 + $0x48] sm:$0xff] }
 0x116   : > { %v1862_v35 = vpop.f32.mrf.mxu0 }
 0x117   : > { %v1050_v48 = vadd.f32 %v1862_v35, %v770_v51  ;;  %v745_v35 = vadd.f32 %v744_v19, %v2333_v4  ;;  %v1072_v15 = vadd.f32 %v2358_v49, %v1047_v26  ;;  %v735_v4 = vadd.f32 %v2337_v9, %v2327_v1  ;;  %v1199_v26 = vld [vmem:[%s2563_s3 + $0x28] sm:$0xff] }
 0x118   : > { %v1000_v37 = vpop.f32.mrf.mxu0  ;;  %v1091_v34 = vmax.f32 %v1073_v7, 0.0  ;;  %v725_v1 = vadd.f32 %v2331_v3, %v2321_v62  ;;  %v715_v62 = vadd.f32 %v2319_v61, %v2315_v59  ;;  %v1194_v7 = vld [vmem:[%s2563_s3] sm:$0xff] }
 0x119   : > { %v1049_v30 = vadd.f32 %v1000_v37, %v765_v55  ;;  %v1075_v39 = vadd.f32 %v2358_v49, %v1050_v48  ;;  %v1046_v37 = vadd.f32 %v1856_v29, %v750_v12  ;;  %v740_v48 = vadd.f32 %v2335_v6, %v2323_v63  ;;  %v1200_v12 = vld [vmem:[%s2563_s3 + $0x30] sm:$0xff] }
 0x11a   : > { %v1865_v38 = vpop.f32.mrf.mxu0  ;;  %v1045_v2 = vadd.f32 %v980_v31, %v745_v35  ;;  %v730_v63 = vadd.f32 %v2325_v0, %v2317_v60  ;;  %v1043_v6 = vadd.f32 %v2353_v28, %v735_v4  ;;  %v720_v60 = vadd.f32 %v2313_v58, %v2311_v57  ;;  %v1196_v35 = vld [vmem:[%s2563_s3 + $0x10] sm:$0xff]  ;;  %v1319_v4 = vld [vmem:[%s2565_s5 + $0x40] sm:$0xff] }
 0x11b   : > { %v1052_v46 = vadd.f32 %v1865_v38, %v780_v41  ;;  %v2574_v38 = vmov 0.0   ;;  %v1074_v5 = vadd.f32 %v2358_v49, %v1049_v30  ;;  %v1093_v22 = vmax.f32 %v1075_v39, 0.0  ;;  %v1202_v39 = vld [vmem:[%s2563_s3 + $0x40] sm:$0xff] }
 0x11c   : > { %v1010_v40 = vpop.f32.mrf.mxu0  ;;  %v1044_v19 = vadd.f32 %v2351_v24, %v740_v48  ;;  %v1071_v29 = vadd.f32 %v2358_v49, %v1046_v37  ;;  %v1070_v31 = vadd.f32 %v2358_v49, %v1045_v2  ;;  %v1090_v41 = vmax.f32 %v1072_v15, 0.0  ;;  %v1195_v37 = vld [vmem:[%s2563_s3 + $0x8] sm:$0xff]  ;;  %1931 = vmatprep.mubr.msk.f32.mxu0 %vm1966_vm10, %v2574_v38  ;;  %v1322_v2 = vld [vmem:[%s2565_s5 + $0x58] sm:$0xff]  ;;  %v1321_v15 = vld [vmem:[%s2565_s5 + $0x50] sm:$0xff] }
 0x11d   : > { %v1051_v52 = vadd.f32 %v1010_v40, %v775_v44  ;;  %v1077_v13 = vadd.f32 %v2358_v49, %v1052_v46  ;;  %v1092_v32 = vmax.f32 %v1074_v5, 0.0  ;;  %v1042_v9 = vadd.f32 %v2347_v23, %v730_v63  ;;  %v1198_v5 = vld [vmem:[%s2563_s3 + $0x20] sm:$0xff]  ;;  %1908 = vmatpush3.msra.mxu0 %v1322_v2 }
 0x11e   : > { %v1868_v43 = vpop.f32.mrf.mxu0  ;;  %v1069_v24 = vadd.f32 %v2358_v49, %v1044_v19  ;;  %v1041_v0 = vadd.f32 %v2349_v27, %v725_v1  ;;  %v1068_v28 = vadd.f32 %v2358_v49, %v1043_v6  ;;  %v1088_v44 = vmax.f32 %v1070_v31, 0.0  ;;  %1909 = vmatprep.subr.mxu0 %v2574_v38  ;;  %v1318_v19 = vld [vmem:[%s2565_s5 + $0x38] sm:$0xff]  ;;  %v1315_v63 = vld [vmem:[%s2565_s5 + $0x20] sm:$0xff]  ;;  %v1313_v31 = vld [vmem:[%s2565_s5 + $0x10] sm:$0xff] }
 0x11f   : > { %v1054_v47 = vadd.f32 %v1868_v43, %v790_v42  ;;  %v1076_v33 = vadd.f32 %v2358_v49, %v1051_v52  ;;  %v1095_v40 = vmax.f32 %v1077_v13, 0.0  ;;  %v1089_v42 = vmax.f32 %v1071_v29, 0.0  ;;  %v1828_v43 = vpop.f32.mrf.mxu1  ;;  %1910 = vmatpush3.msra.mxu0 %v1321_v15  ;;  %v1317_v29 = vld [vmem:[%s2565_s5 + $0x30] sm:$0xff]  ;;  %v1314_v6 = vld [vmem:[%s2565_s5 + $0x18] sm:$0xff]  ;;  %v1312_v1 = vld [vmem:[%s2565_s5 + $0x8] sm:$0xff] }
 0x120   : > { %v1020_v50 = vpop.f32.mrf.mxu0  ;;  %v1040_v3 = vadd.f32 %v2343_v21, %v720_v60  ;;  %v1067_v23 = vadd.f32 %v2358_v49, %v1042_v9  ;;  %v1087_v46 = vmax.f32 %v1069_v24, 0.0  ;;  %v800_v57 = vadd.f32 %v1828_v43, %v2339_v10  ;;  %1911 = vmatprep.subr.mxu0 %v2574_v38  ;;  %v1311_v9 = vld [vmem:[%s2565_s5] sm:$0xff] }
 0x121   : > { %v1079_v53 = vadd.f32 %v2358_v49, %v1054_v47  ;;  %v1053_v54 = vadd.f32 %v1020_v50, %v785_v45  ;;  %v1094_v11 = vmax.f32 %v1076_v33, 0.0  ;;  %v794_v47 = vpop.f32.mrf.mxu1  ;;  %v1039_v58 = vadd.f32 %v2345_v17, %v715_v62  ;;  %v1207_v33 = vld [vmem:[%s2563_s3 + $0x68] sm:$0xff] }
 0x122   : > { %v1871_v45 = vpop.f32.mrf.mxu0  ;;  %v1066_v27 = vadd.f32 %v2358_v49, %v1041_v0  ;;  %v1086_v50 = vmax.f32 %v1068_v28, 0.0  ;;  %v795_v59 = vadd.f32 %v794_v47, %v2341_v14  ;;  %v1065_v61 = vadd.f32 %v2358_v49, %v1040_v3 }
 0x123   : > { %v1097_v18 = vmax.f32 %v1079_v53, 0.0  ;;  %v1078_v16 = vadd.f32 %v2358_v49, %v1053_v54  ;;  %v1085_v21 = vmax.f32 %v1067_v23, 0.0  ;;  %v1056_v52 = vadd.f32 %v1871_v45, %v800_v57 }
 0x124   : > { %v1030_v51 = vpop.f32.mrf.mxu0  ;;  %v1064_v10 = vadd.f32 %v2358_v49, %v1039_v58  ;;  %v1084_v53 = vmax.f32 %v1066_v27, 0.0  ;;  %v1083_v54 = vmax.f32 %v1065_v61, 0.0  ;;  %v1965_v30 = vmov 1.0  }
 0x125   : > { %v1096_v36 = vmax.f32 %v1078_v16, 0.0  ;;  %1125 = vmatpush1.msra.mxu1 %v1097_v18  ;;  %v1055_v17 = vadd.f32 %v1030_v51, %v795_v59  ;;  %v1081_v55 = vadd.f32 %v2358_v49, %v1056_v52  ;;  %v1969_v51 = vmov 0   ;;  %v1627_v59 = vld [vmem:[%s2566_s6] ss:$0 sm:$0xff] }
 0x126   : > { %1126 = vmatprep.subr.mxu1 %v2574_v38  ;;  %v1082_v14 = vmax.f32 %v1064_v10, 0.0  ;;  %1954 = vset.pattern.permute.xlu1 %v1969_v51 }
 0x127   : > { %1127 = vmatpush1.msra.mxu1 %v1096_v36  ;;  %v1080_v13 = vadd.f32 %v2358_v49, %v1055_v17  ;;  %v1099_v18 = vmax.f32 %v1081_v55, 0.0  ;;  %v1208_v49 = vld [vmem:[%s2563_s3 + $0x70] sm:$0xff]  ;;  %v1205_v36 = vld [vmem:[%s2563_s3 + $0x58] sm:$0xff]  ;;  %1955 = vset.pattern.permute.xlu0 %v1969_v51 }
 0x128   : > { %1128 = vmatprep.subr.mxu1 %v2574_v38 }
 0x129   : > { %1129 = vmatpush1.msra.mxu1 %v1095_v40  ;;  %v1098_v16 = vmax.f32 %v1080_v13, 0.0  ;;  %v1201_v40 = vld [vmem:[%s2563_s3 + $0x38] sm:$0xff] }
 0x12a   : > { %1130 = vmatprep.subr.mxu1 %v2574_v38 }
 0x12b   : > { %1131 = vmatpush1.msra.mxu1 %v1094_v11  ;;  %v1197_v11 = vld [vmem:[%s2563_s3 + $0x18] sm:$0xff] }
 0x12c   : > { %1132 = vmatprep.subr.mxu1 %v2574_v38 }
 0x12d   : > { %1133 = vmatpush1.msra.mxu1 %v1093_v22 }
 0x12e   : > { %1134 = vmatprep.subr.mxu1 %v2574_v38 }
 0x12f   : > { %1135 = vmatpush1.msra.mxu1 %v1092_v32  ;;  %v1320_v32 = vld [vmem:[%s2565_s5 + $0x48] sm:$0xff] }
 0x130   : > { %1136 = vmatprep.subr.mxu1 %v2574_v38  ;;  %1912 = vmatpush3.msra.mxu0 %v1320_v32 }
 0x131   : > { %1137 = vmatpush1.msra.mxu1 %v1091_v34  ;;  %1913 = vmatprep.subr.mxu0 %v2574_v38  ;;  %v1316_v34 = vld [vmem:[%s2565_s5 + $0x28] sm:$0xff] }
 0x132   : > { %1138 = vmatprep.subr.mxu1 %v2574_v38  ;;  %1914 = vmatpush3.msra.mxu0 %v1319_v4 }
 0x133   : > { %1139 = vmatpush1.msra.mxu1 %v1090_v41  ;;  %1915 = vmatprep.subr.mxu0 %v2574_v38  ;;  %v1626_v41 = vld [vmem:[%s2564_s4] ss:$0 sm:$0xff] }
 0x134   : > { %1140 = vmatprep.subr.mxu1 %v2574_v38  ;;  %1916 = vmatpush3.msra.mxu0 %v1318_v19 }
 0x135   : > { %1141 = vmatpush1.msra.mxu1 %v1089_v42  ;;  %1917 = vmatprep.subr.mxu0 %v2574_v38 }
 0x136   : > { %1142 = vmatprep.subr.mxu1 %v2574_v38  ;;  %1918 = vmatpush3.msra.mxu0 %v1317_v29 }
 0x137   : > { %1143 = vmatpush1.msra.mxu1 %v1088_v44  ;;  %1919 = vmatprep.subr.mxu0 %v2574_v38 }
 0x138   : > { %1144 = vmatprep.subr.mxu1 %v2574_v38  ;;  %1920 = vmatpush3.msra.mxu0 %v1316_v34 }
 0x139   : > { %1145 = vmatpush1.msra.mxu1 %v1087_v46  ;;  %1921 = vmatprep.subr.mxu0 %v2574_v38 }
 0x13a   : > { %1146 = vmatprep.subr.mxu1 %v2574_v38  ;;  %1922 = vmatpush3.msra.mxu0 %v1315_v63 }
 0x13b   : > { %1147 = vmatpush1.msra.mxu1 %v1086_v50  ;;  %1923 = vmatprep.subr.mxu0 %v2574_v38  ;;  %v1406_v50 = vld [vmem:[%s2568_s8] sm:$0x1f] }
 0x13c   : > { %1148 = vmatprep.subr.mxu1 %v2574_v38  ;;  %1924 = vmatpush3.msra.mxu0 %v1314_v6 }
 0x13d   : > { %1149 = vmatpush1.msra.mxu1 %v1085_v21  ;;  %1925 = vmatprep.subr.mxu0 %v2574_v38 }
 0x13e   : > { %1150 = vmatprep.subr.mxu1 %v2574_v38  ;;  %1926 = vmatpush3.msra.mxu0 %v1313_v31 }
 0x13f   : > { %1151 = vmatpush1.msra.mxu1 %v1084_v53  ;;  %1927 = vmatprep.subr.mxu0 %v2574_v38  ;;  %v1405_v53 = vld [vmem:[%s2567_s7] sm:$0x1f] }
 0x140   : > { %1152 = vmatprep.subr.mxu1 %v2574_v38  ;;  %1928 = vmatpush3.msra.mxu0 %v1312_v1 }
 0x141   : > { %1153 = vmatpush1.msra.mxu1 %v1083_v54  ;;  %1929 = vmatprep.subr.mxu0 %v2574_v38 }
 0x142   : > { %1154 = vmatprep.subr.mxu1 %v2574_v38  ;;  %1930 = vmatpush3.msra.mxu0 %v1311_v9 }
 0x143   : > { %1155 = vmatpush1.msra.mxu1 %v1082_v14  ;;  %1409 = vperm.xlu1 %1954, %v1406_v50  }
 0x144   : > { %1184 = vmatprep.subr.mxu1 %v2574_v38 }
 0x145   : > { %1623 = vmatpush2.msk.msra.mxu1 %vm812_vm2, %v1099_v18 }
 0x146   : > { %1186 = vmatprep.subr.mxu1 %v2574_v38 }
 0x147   : > { %1187 = vmatpush2.msra.mxu1 %v1098_v16 }
 0x148   : > { %1625 = vmatmul.mubr.msk.f32.vlgmr.msra.gmra.mxu1 %vm2307_vm9, %v1965_v30  ;;  %1872 = vmatprep.subr.mxu1 %v2574_v38 }
 0x149   : > { %1873 = vmatpush3.msra.mxu1 %v1209_v20  ;;  %1904 = vmatprep.mubr.msk.f32.mxu1 %vm1966_vm10, %v2574_v38 }
 0x14a   : > { %1874 = vmatprep.subr.mxu1 %v2574_v38 }
 0x14b   : > { %1875 = vmatpush3.msra.mxu1 %v1208_v49 }
 0x14c   : > { %1876 = vmatprep.subr.mxu1 %v2574_v38 }
 0x14d   : > { %1877 = vmatpush3.msra.mxu1 %v1207_v33 }
 0x14e   : > { %1878 = vmatprep.subr.mxu1 %v2574_v38 }
 0x14f   : > { %1879 = vmatpush3.msra.mxu1 %v1206_v56 }
 0x150   : > { %1880 = vmatprep.subr.mxu1 %v2574_v38 }
 0x151   : > { %1881 = vmatpush3.msra.mxu1 %v1205_v36 }
 0x152   : > { %1882 = vmatprep.subr.mxu1 %v2574_v38 }
 0x153   : > { %1883 = vmatpush3.msra.mxu1 %v1204_v8 }
 0x154   : > { %1884 = vmatprep.subr.mxu1 %v2574_v38 }
 0x155   : > { %1885 = vmatpush3.msra.mxu1 %v1203_v25 }
 0x156   : > { %1886 = vmatprep.subr.mxu1 %v2574_v38 }
 0x157   : > { %1887 = vmatpush3.msra.mxu1 %v1202_v39 }
 0x158   : > { %1888 = vmatprep.subr.mxu1 %v2574_v38 }
 0x159   : > { %1889 = vmatpush3.msra.mxu1 %v1201_v40 }
 0x15a   : > { %1890 = vmatprep.subr.mxu1 %v2574_v38 }
 0x15b   : > { %1891 = vmatpush3.msra.mxu1 %v1200_v12 }
 0x15c   : > { %1892 = vmatprep.subr.mxu1 %v2574_v38 }
 0x15d   : > { %1893 = vmatpush3.msra.mxu1 %v1199_v26 }
 0x15e   : > { %1894 = vmatprep.subr.mxu1 %v2574_v38 }
 0x15f   : > { %1895 = vmatpush3.msra.mxu1 %v1198_v5 }
 0x160   : > { %1896 = vmatprep.subr.mxu1 %v2574_v38 }
 0x161   : > { %1897 = vmatpush3.msra.mxu1 %v1197_v11 }
 0x162   : > { %1898 = vmatprep.subr.mxu1 %v2574_v38 }
 0x163   : > { %1899 = vmatpush3.msra.mxu1 %v1196_v35 }
 0x164   : > { %1900 = vmatprep.subr.mxu1 %v2574_v38 }
 0x165   : > { %1901 = vmatpush3.msra.mxu1 %v1195_v37 }
 0x166   : > { %1902 = vmatprep.subr.mxu1 %v2574_v38 }
 0x167   : > { %1903 = vmatpush3.msra.mxu1 %v1194_v7 }
 0x168   : > { %1934 = vmatprep.subr.mxu1 %v2574_v38 }
 0x1be   : > { %v1410_v17 = vpop.permute.xlu1 %1409 }
 0x208   : > { %v1190_v22 = vpop.f32.mrf.mxu1 }
 0x209   : > { %1905 = vmatmul.mubr.f32.vlgmr.msra.gmra.mxu1 %v1190_v22 }
 0x20a   : > { %v1192_v48 = vpop.f32.mrf.mxu1  ;;  %1936 = vmatprep.mubr.msk.f32.mxu1 %vm1966_vm10, %v2574_v38 }
 0x2c9   : > { %v1283_v24 = vpop.f32.mrf.mxu1 }
 0x2ca   : > { %v1284_v42 = vadd.f32 %v1626_v41, %v1283_v24 }
 0x2cb   : > { %v1906_v43 = vpop.f32.mrf.mxu1 }
 0x2cc   : > { %v1287_v60 = vmax.f32 %v1284_v42, 0.0 }
 0x2ce   : > { %v1289_v0 = vrot.slane %v1287_v60, 7 }
 0x2d0   : > { %v1292_v28 = vsel %vm1291_vm11, 0.0, %v1289_v0  ;;  %v1293_v44 = vsel %vm1291_vm11, %v1289_v0, 0.0 }
 0x2d1   : > { %v1297_v45 = vrot.slane %v1293_v44, 1  ;;  %v1296_v62 = vrot.slane %v1292_v28, 1  ;;  %v1302_v3 = vrot.slane %v1292_v28, 2  ;;  %v1303_v23 = vrot.slane %v1293_v44, 2 }
 0x2d3   : > { %v1298_v46 = vsel %vm384_vm0, %v1296_v62, %v1297_v45  ;;  %v1304_v47 = vsel %vm812_vm2, %v1302_v3, %v1303_v23 }
 0x2d4   : > { %1299 = vrot.lane.b32.xlu0 %v1298_v46, %s1967_s28 }
 0x2d8   : > { %1305 = vrot.lane.b32.xlu0 %v1304_v47, %s1968_s29 }
 0x346   : > { %v1300_v38 = vpop.permute.xlu0 %1299 }
 0x347   : > { %v1309_v57 = vsel %vm1308_vm12, %v1292_v28, %v1300_v38 }
 0x34a   : > { %v1306_v58 = vpop.permute.xlu0 %1305 }
 0x34b   : > { %v1310_v27 = vsel %vm420_vm1, %v1309_v57, %v1306_v58 }
 0x34c   : > { %1932 = vmatmul.mubr.msk.f32.vlgmr.msra.gmra.mxu0 %vm1330_vm13, %v1310_v27 }
 0x40c   : > { %v1400_v61 = vpop.f32.mrf.mxu0 }
 0x40d   : > { %v1401_v21 = vadd.f32 %v1627_v59, %v1400_v61 }
 0x40e   : > { %v1933_v52 = vpop.f32.mrf.mxu0 }
 0x40f   : > { %v1404_v10 = vmax.f32 %v1401_v21, 0.0 }
 0x411   : > { %1935 = vmatpush3.xpose.msk.msra.mxu1 %vm1308_vm12, %v1404_v10 }
 0x414   : > { %1937 = vmatmul.mubr.msk.f32.vlgmr.msra.gmra.mxu1 %vm1308_vm12, %v1405_v53 }
 0x4d4   : > { %v1484_v54 = vpop.f32.mrf.mxu1 }
 0x4d5   : > { %v1485_v55 = vadd.f32 %v1484_v54, %v1410_v17 }
 0x4d6   : > { %v1938_v14 = vpop.f32.mrf.mxu1 }
 0x4d7   : > { %1489 = vst.msk [vmem:[%s330_s21] sm:$0x1f] %vm1488_vm14, %v1485_v55 }
 0x4d8 PF: > { %s19_s30 = sadd.s32 1, %s1962_s30  }
 0x4d9   : > { %p16_p4 = scmp.ge.s32.totalorder %s19_s30, 4  }
 0x4db   :  { %18 = sbr.rel (!%p16_p4) target bundleno = 1 (0x1), region = 88 }

</bundles_post_ra>
